<compile_context>
chip_gen: v5e
topology: v5e:2x2
jax: 0.10.0
libtpu: 0.0.40
codegen_flags: <defaults>
</compile_context>

<pallas_src>
import jax
import jax.numpy as jnp
from jax.experimental import pallas as pl
from jax.experimental.pallas import tpu as pltpu


def _round_up(n, m):
    return ((n + m - 1) // m) * m


def _dyt_kernel(alpha_ref, x_ref, gamma_ref, beta_ref, out_ref):
    # alpha_ref: (1, 1) f32 in SMEM (scalar parameter)
    # x_ref:     (TM, D) tile in VMEM
    # gamma_ref, beta_ref: (1, D) in VMEM, broadcast over the TM rows
    alpha = alpha_ref[0, 0]
    x = x_ref[...].astype(jnp.float32)
    y = jnp.tanh(alpha * x)                          # EUP transcendental
    g = gamma_ref[...].astype(jnp.float32)           # (1, D) broadcasts to (TM, D)
    b = beta_ref[...].astype(jnp.float32)
    out_ref[...] = (g * y + b).astype(out_ref.dtype)  # VPU FMA + store


def dynamic_tanh(x, alpha, gamma, beta, *, block_rows=256):
    """y = gamma * tanh(alpha * x) + beta, over the last axis of x."""
    orig_shape = x.shape
    D = orig_shape[-1]
    assert gamma.shape == (D,) and beta.shape == (D,)

    x2 = x.reshape(-1, D)
    M = x2.shape[0]

    # Tile rows: multiple of 8 (sublane), capped at block_rows; pad M so the
    # grid divides evenly (padding is sliced off afterwards).
    TM = min(block_rows, _round_up(M, 8))
    Mp = _round_up(M, TM)
    if Mp != M:
        x2 = jnp.pad(x2, ((0, Mp - M), (0, 0)))

    alpha_smem = jnp.asarray(alpha, dtype=jnp.float32).reshape(1, 1)
    gamma2 = gamma.reshape(1, D)
    beta2 = beta.reshape(1, D)

    grid = (Mp // TM,)
    out = pl.pallas_call(
        _dyt_kernel,
        out_shape=jax.ShapeDtypeStruct((Mp, D), x.dtype),
        grid=grid,
        in_specs=[
            # scalar alpha on the scalar path (SMEM), same block every step
            pl.BlockSpec((1, 1), lambda i: (0, 0),
                         memory_space=pltpu.MemorySpace.SMEM),
            # x: pipelined (TM, D) tiles over the flattened leading dims
            pl.BlockSpec((TM, D), lambda i: (i, 0)),
            # gamma / beta: single lane-dense row, resident across the grid
            pl.BlockSpec((1, D), lambda i: (0, 0)),
            pl.BlockSpec((1, D), lambda i: (0, 0)),
        ],
        out_specs=pl.BlockSpec((TM, D), lambda i: (i, 0)),
        compiler_params=pltpu.CompilerParams(
            dimension_semantics=("parallel",)),
    )(alpha_smem, x2, gamma2, beta2)

    if Mp != M:
        out = out[:M]
    return out.reshape(orig_shape)


class DynamicTanh:
    """JAX/Pallas port of the PyTorch DynamicTanh module."""

    def __init__(self, dim, init_alpha=10.0, dtype=jnp.float32):
        self.dim = dim
        self.alpha = jnp.ones((1,), dtype) * init_alpha   # nn.Parameter(ones(1)*init_alpha)
        self.gamma = jnp.ones((dim,), dtype)               # nn.Parameter(ones(dim))
        self.beta = jnp.zeros((dim,), dtype)               # nn.Parameter(zeros(dim))

    def __call__(self, x):
        return dynamic_tanh(x, self.alpha, self.gamma, self.beta)


if __name__ == "__main__":
    key = jax.random.PRNGKey(0)
    k_x, k_x2, k_g, k_b = jax.random.split(key, 4)

    batch, seq, dim = 2, 8, 256   # dim multiple of 128 -> lane-dense stores

    module = DynamicTanh(dim, init_alpha=10.0)
    # Randomize the affine params so gamma/beta are actually exercised
    # (default init is gamma=1, beta=0 as in the PyTorch module).
    module.gamma = jax.random.normal(k_g, (dim,), dtype=jnp.float32)
    module.beta = jax.random.normal(k_b, (dim,), dtype=jnp.float32)

    # Case 1: (batch, seq, dim) input
    x = jax.random.normal(k_x, (batch, seq, dim), dtype=jnp.float32)
    out = jax.block_until_ready(module(x))
    ref = module.gamma * jnp.tanh(module.alpha * x) + module.beta
    assert out.shape == x.shape
    assert jnp.allclose(out, ref, atol=2e-5, rtol=2e-5), "mismatch (3D case)"

    # Case 2: 2D (seq, dim) input, exercises the generic flatten/reshape path
    x2 = jax.random.normal(k_x2, (seq, dim), dtype=jnp.float32)
    out2 = jax.block_until_ready(module(x2))
    ref2 = module.gamma * jnp.tanh(module.alpha * x2) + module.beta
    assert out2.shape == x2.shape
    assert jnp.allclose(out2, ref2, atol=2e-5, rtol=2e-5), "mismatch (2D case)"

    print("KERNEL_OK")
</pallas_src>

<mosaic_0001>
module attributes {stable_mosaic.version = 11 : i64} {
  func.func @_dyt_kernel(%arg0: i32, %arg1: memref<1x1xf32, #tpu.memory_space<smem>>, %arg2: memref<16x256xf32, #tpu.memory_space<vmem>>, %arg3: memref<1x256xf32, #tpu.memory_space<vmem>>, %arg4: memref<1x256xf32, #tpu.memory_space<vmem>>, %arg5: memref<16x256xf32, #tpu.memory_space<vmem>>) attributes {dimension_semantics = [#tpu.dimension_semantics<parallel>], iteration_bounds = array<i64: 1>, scalar_prefetch = 0 : i64, scratch_operands = 0 : i64, tpu.core_type = #tpu.core_type<tc>, window_params = [{transform_indices = @transform_0, window_bounds = array<i64: 1, 1>}, {transform_indices = @transform_1, window_bounds = array<i64: 16, 256>}, {pipeline_mode = #tpu.pipeline_mode<synchronous>, transform_indices = @transform_2, window_bounds = array<i64: 1, 256>}, {pipeline_mode = #tpu.pipeline_mode<synchronous>, transform_indices = @transform_3, window_bounds = array<i64: 1, 256>}, {transform_indices = @transform_4, window_bounds = array<i64: 16, 256>}]} {
    %c0 = arith.constant 0 : index
    %c0_0 = arith.constant 0 : index
    %0 = memref.load %arg1[%c0, %c0_0] : memref<1x1xf32, #tpu.memory_space<smem>>
    %c0_1 = arith.constant 0 : index
    %c0_2 = arith.constant 0 : index
    %1 = vector.load %arg2[%c0_1, %c0_2] : memref<16x256xf32, #tpu.memory_space<vmem>>, vector<16x256xf32>
    %2 = vector.broadcast %0 : f32 to vector<16x256xf32>
    %3 = arith.mulf %2, %1 : vector<16x256xf32>
    %4 = math.tanh %3 : vector<16x256xf32>
    %c0_3 = arith.constant 0 : index
    %c0_4 = arith.constant 0 : index
    %5 = vector.load %arg3[%c0_3, %c0_4] : memref<1x256xf32, #tpu.memory_space<vmem>>, vector<1x256xf32>
    %c0_5 = arith.constant 0 : index
    %c0_6 = arith.constant 0 : index
    %6 = vector.load %arg4[%c0_5, %c0_6] : memref<1x256xf32, #tpu.memory_space<vmem>>, vector<1x256xf32>
    %7 = vector.broadcast %5 : vector<1x256xf32> to vector<16x256xf32>
    %8 = arith.mulf %7, %4 : vector<16x256xf32>
    %9 = vector.broadcast %6 : vector<1x256xf32> to vector<16x256xf32>
    %10 = arith.addf %8, %9 : vector<16x256xf32>
    %c0_7 = arith.constant 0 : index
    %c0_8 = arith.constant 0 : index
    %11 = vector.load %arg5[%c0_7, %c0_8] : memref<16x256xf32, #tpu.memory_space<vmem>>, vector<16x256xf32>
    tpu.vector_store %arg5[%c0_7, %c0_8], %10 {strides = array<i32>} : memref<16x256xf32, #tpu.memory_space<vmem>>, vector<16x256xf32>,
    return
  }
  func.func @transform_0(%arg0: i32) -> (i32, i32) {
    %c0_i32 = arith.constant 0 : i32
    %c0_i32_0 = arith.constant 0 : i32
    %c0_i32_1 = arith.constant 0 : i32
    return %c0_i32, %c0_i32_0 : i32, i32
  }
  func.func @transform_1(%arg0: i32) -> (i32, i32) {
    %c0_i32 = arith.constant 0 : i32
    %c0_i32_0 = arith.constant 0 : i32
    return %arg0, %c0_i32 : i32, i32
  }
  func.func @transform_2(%arg0: i32) -> (i32, i32) {
    %c0_i32 = arith.constant 0 : i32
    %c0_i32_0 = arith.constant 0 : i32
    %c0_i32_1 = arith.constant 0 : i32
    return %c0_i32, %c0_i32_0 : i32, i32
  }
  func.func @transform_3(%arg0: i32) -> (i32, i32) {
    %c0_i32 = arith.constant 0 : i32
    %c0_i32_0 = arith.constant 0 : i32
    %c0_i32_1 = arith.constant 0 : i32
    return %c0_i32, %c0_i32_0 : i32, i32
  }
  func.func @transform_4(%arg0: i32) -> (i32, i32) {
    %c0_i32 = arith.constant 0 : i32
    %c0_i32_0 = arith.constant 0 : i32
    return %arg0, %c0_i32 : i32, i32
  }
}

</mosaic_0001>

<bundles_post_ra>
// kernel: tpu_custom_call.1
= control target key start
LH: loop header
LB: loop body
LE: loop exit
PB: predicated region body
PF: predicated region fallthrough
CT: control target
= control target key end

     0   :  { %10 = vsyncpa [#allocation4], 0  ;;  %s249_s0 = inlined_call_operand.<no memory space> [shape: f32[1,1], index: 0, kind: input, shape index: {}]   ;;  %s250_s1 = inlined_call_operand.hbm [shape: f32[16,256], index: 1, kind: input, shape index: {}]   ;;  %s251_s2 = inlined_call_operand.vmem [shape: f32[1,256], index: 2, kind: input, shape index: {}]   ;;  %s252_s3 = inlined_call_operand.hbm [shape: f32[1,256], index: 3, kind: input, shape index: {}]   ;;  %s253_s4 = inlined_call_operand.hbm [shape: f32[16,256], index: 4, kind: output, shape index: {}]  }
   0x1   :  { %11 = vsyncpa [#allocation7], 0 }
   0x2   :  { %12 = vsyncpa [#allocation5], 0  ;;  %s19_s17 = sshll.u32 %s250_s1, 4  ;;  %s198_s18 = smov [#allocation3]   ;;  %s20_s17 = int_to_ptr.hbm [resolvable:$true] %s19_s17 }
   0x3   :  { %s21_s19 = sshll.u32 %s198_s18, 4  ;;  %s35_s22 = sshll.u32 %s252_s3, 4  ;;  %s22_s19 = int_to_ptr.vmem [resolvable:$true] %s21_s19  ;;  %s36_s22 = int_to_ptr.hbm [resolvable:$true] %s35_s22 }
   0x4   :  { %s199_s23 = smov 256   ;;  %s200_s24 = smov 16  }
   0x5   :  { %27 = dma.hbm_to_vmem [thread:$0]  %s20_s17, 512, %s22_s19, [#allocation4], %s199_s23, %s199_s23, %s200_s24  }
   0x6   :  { %s201_s25 = smov [#allocation6]  }
   0x7   :  { %s37_s26 = sshll.u32 %s201_s25, 4  ;;  %s38_s26 = int_to_ptr.vmem [resolvable:$true] %s37_s26 }
   0x8   :  { %40 = dma.hbm_to_vmem [thread:$0]  %s36_s22, 32, %s38_s26, [#allocation7]  }
   0x9   :  { %192 = dma.done.wait [#allocation4], 512  }
   0xa   :  { %193 = vsyncadd [#allocation4], 4294966784 }
   0xb   :  { %194 = dma.done.wait [#allocation7], 32  }
   0xc   :  { %195 = vsyncadd [#allocation7], 4294967264  ;;  %v54_v0 = vstv %s249_s0  ;;  %v50_v1 = vld [vmem:[#allocation3] sm:$0xff]  ;;  %v51_v3 = vld [vmem:[#allocation3 + $0x8] sm:$0xff]  ;;  %s202_s0 = smov [#allocation8]   ;;  %s93_s5 = sshll.u32 %s253_s4, 4  ;;  %s94_s5 = int_to_ptr.hbm [resolvable:$true] %s93_s5 }
   0xd   :  { %v55_v2 = vmul.f32 %v54_v0, %v50_v1  ;;  %v52_v4 = vld [vmem:[#allocation3 + $0x10] sm:$0xff]  ;;  %v53_v5 = vld [vmem:[#allocation3 + $0x18] sm:$0xff]  ;;  %v56_v6 = vmul.f32 %v54_v0, %v51_v3  ;;  %v63_v9 = vld [vmem:[%s251_s2] sm:$0x3]  ;;  %s91_s29 = sshll.u32 %s202_s0, 4  ;;  %s92_s29 = int_to_ptr.vmem [resolvable:$true] %s91_s29 }
   0xe   :  { %v57_v7 = vmul.f32 %v54_v0, %v52_v4  ;;  %v58_v8 = vmul.f32 %v54_v0, %v53_v5  ;;  %v64_v10 = vld [vmem:[#allocation6] sm:$0x3]  ;;  %v66_v11 = vperm.slane %v63_v9, 0  ;;  %v67_v12 = vperm.slane %v63_v9, 1 }
   0xf   :  { %112 = vtanh.f32 %v55_v2  ;;  %v75_v13 = vperm.slane %v64_v10, 0  ;;  %v76_v15 = vperm.slane %v64_v10, 1 }
  0x10   :  { %114 = vtanh.f32 %v56_v6 }
  0x11   :  { %116 = vtanh.f32 %v57_v7 }
  0x12   :  { %118 = vtanh.f32 %v58_v8 }
  0x15   :  { %v113_v14 = vpop.eup %112 }
  0x16   :  { %v115_v16 = vpop.eup %114  ;;  %v70_v17 = vmul.f32 %v113_v14, %v66_v11 }
  0x17   :  { %v117_v18 = vpop.eup %116  ;;  %v71_v19 = vmul.f32 %v115_v16, %v67_v12 }
  0x18   :  { %v119_v20 = vpop.eup %118  ;;  %v79_v21 = vadd.f32 %v75_v13, %v70_v17  ;;  %v72_v22 = vmul.f32 %v117_v18, %v66_v11 }
  0x19   :  { %v80_v23 = vadd.f32 %v76_v15, %v71_v19  ;;  %v73_v24 = vmul.f32 %v119_v20, %v67_v12 }
  0x1a   :  { %83 = vst [vmem:[#allocation8] sm:$0xff] %v79_v21  ;;  %v81_v25 = vadd.f32 %v75_v13, %v72_v22 }
  0x1b   :  { %84 = vst [vmem:[#allocation8 + $0x8] sm:$0xff] %v80_v23  ;;  %v82_v26 = vadd.f32 %v76_v15, %v73_v24 }
  0x1c   :  { %85 = vst [vmem:[#allocation8 + $0x10] sm:$0xff] %v81_v25 }
  0x1d   :  { %86 = vst [vmem:[#allocation8 + $0x18] sm:$0xff] %v82_v26 }
  0x1e   :  { %99 = dma.vmem_to_hbm [thread:$0]  %s92_s29, 512, %s94_s5, [#allocation5], %s199_s23, %s199_s23, %s200_s24  }
  0x1f   :  { %196 = dma.done.wait [#allocation5], 512  }
  0x20   :  { %197 = vsyncadd [#allocation5], 4294966784 }
  0x21   :  { %104 = vsyncpa [#allocation4], 1 }
  0x22   :  { %105 = vsyncpa [#allocation7], 1 }
  0x23   :  { %106 = vsyncpa [#allocation5], 1 }

</bundles_post_ra>
